<compile_context>
chip_gen: v5e
topology: v5e:2x2
jax: 0.10.0
libtpu: 0.0.40
codegen_flags: <defaults>
</compile_context>

<pallas_src>
import functools

import jax
import jax.numpy as jnp
from jax import lax
from jax.experimental import pallas as pl
from jax.experimental.pallas import tpu as pltpu


# --------------------------------------------------------------------------- #
# Kernel
# --------------------------------------------------------------------------- #
def _self_attention_kernel(x_ref, wqkv_ref, wo_ref, y_ref, att_ref, *,
                           heads, internal_exp_dtype):
    cd = wqkv_ref.dtype                       # matmul operand dtype (bf16)
    bt, seq, _ = x_ref.shape
    hdh = wo_ref.shape[0]
    dh = hdh // heads

    # Fused Q|K|V projection over the whole batch tile:
    #   [bt, seq, dim_in] . [dim_in, 3*hdh]   (cd operands, f32 accumulation)
    x = x_ref[...].astype(cd)                 # in-kernel cast (no wrapper HBM pass)
    qkv = lax.dot_general(x, wqkv_ref[...], (((2,), (0,)), ((), ())),
                          preferred_element_type=jnp.float32)
    qkv = qkv.astype(cd)                      # one bf16 copy lives across the head loop

    # TODO(synk): for heads >> 8 move this static unroll to a lax.fori_loop or a
    # grid axis to bound vreg live ranges.
    y_heads = []
    for h in range(heads):
        q = qkv[..., h * dh:(h + 1) * dh]
        k = qkv[..., hdh + h * dh:hdh + (h + 1) * dh]
        v = qkv[..., 2 * hdh + h * dh:2 * hdh + (h + 1) * dh]

        # E^T[b, j, i] = sum_d K[b,j,d] Q[b,i,d] -- both operands contract their
        # minor (lane) axis: MXU-natural batched form, no transposes.
        e_t = lax.dot_general(k, q, (((2,), (2,)), ((0,), (0,))),
                              preferred_element_type=jnp.float32)    # [bt, sk, sq]

        # Internal softmax over keys (axis 1 of E^T).  This path only feeds the
        # bf16 A^T @ V matmul, so on v6e/v7x the exponent runs in bf16 (EUP bf16
        # path); the denominator uses the ~free approx EUP reciprocal.
        m = jnp.max(e_t, axis=1, keepdims=True)
        p = jnp.exp((e_t - m).astype(internal_exp_dtype)).astype(jnp.float32)
        a_t = p * pl.reciprocal(jnp.sum(p, axis=1, keepdims=True), approx=True)

        # TODO(synk): nn.Dropout(p=0.5) is identity in eval mode; training-mode
        # dropout (pltpu.prng_random_bits mask on a_t) is not replicated here.

        # Y_h[b, t, d] = sum_i A[b,i,t] V[b,i,d]   (== A^T @ V, PGL-SUM quirk),
        # standard batched contraction (lhs minor x rhs second-minor).
        yh = lax.dot_general(a_t.astype(cd), v, (((2,), (1,)), ((0,), (0,))),
                             preferred_element_type=jnp.float32)     # [bt, sq, dh]
        y_heads.append(yh.astype(cd))

        if h == heads - 1:
            # Returned attention weights (last head only, as in the torch code),
            # produced directly in the final [b, query, key] orientation so the
            # wrapper does no extra HBM transpose pass.  Exact f32 softmax so
            # rows sum to 1 (the approx reciprocal is kept off this output).
            e = lax.dot_general(q, k, (((2,), (2,)), ((0,), (0,))),
                                preferred_element_type=jnp.float32)  # [bt, sq, sk]
            mo = jnp.max(e, axis=-1, keepdims=True)
            po = jnp.exp(e - mo)
            att_ref[...] = po / jnp.sum(po, axis=-1, keepdims=True)

    # One deep-K output projection (lane-concat of head outputs) instead of a
    # per-head fold with (heads-1) full-width f32 adds:
    #   [bt, seq, hdh] . [hdh, dim_out]
    y_cat = y_heads[0] if heads == 1 else jnp.concatenate(y_heads, axis=-1)
    y_ref[...] = lax.dot_general(y_cat, wo_ref[...], (((2,), (0,)), ((), ())),
                                 preferred_element_type=jnp.float32)

    # TODO(synk): for production sequence lengths, add a key-axis grid dimension
    # with an online (flash-style) softmax so the resident [bt, seq, seq] scores
    # do not blow VMEM (v7x only has 64 MiB).


# --------------------------------------------------------------------------- #
# Host-side helpers
# --------------------------------------------------------------------------- #
def _default_internal_exp_dtype():
    """bf16 exponent only on generations with a bf16 EUP path (v6e/v7x)."""
    try:
        kind = jax.devices()[0].device_kind.lower()
    except Exception:  # pragma: no cover
        return jnp.float32
    if ("v6" in kind) or ("v7" in kind) or ("7x" in kind):
        return jnp.bfloat16
    return jnp.float32


def _vmem_bytes_estimate(bt, seq, dim_in, dim_out, hdh, heads):
    """Rough per-grid-step VMEM footprint (double-buffered blocks + intermediates)."""
    dh = hdh // heads
    io_blocks = 2 * (bt * seq * dim_in * 4        # x block (f32)
                     + bt * seq * dim_out * 4     # y block (f32)
                     + bt * seq * seq * 4)        # att block (f32)
    weights = 2 * (dim_in * 3 * hdh + hdh * dim_out) * 2   # bf16 weights
    interm = (bt * seq * 3 * hdh * 2              # qkv (bf16)
              + 4 * bt * seq * seq * 4            # e_t / p / a_t / e (f32)
              + bt * seq * hdh * 2                # concatenated head outputs (bf16)
              + bt * seq * max(dh, dim_out) * 4)  # yh / output product (f32)
    return io_blocks + weights + interm


def _pick_batch_tile(bs, seq, dim_in, dim_out, hdh, heads, *,
                     target_steps=8, vmem_budget=24 * 1024 * 1024):
    """VMEM-aware tile choice that also prefers a deep grid (>= target_steps),
    so the DMA pipeline has something to hide behind (and both v7x TCs get work)."""
    feasible = [bt for bt in range(1, bs + 1) if bs % bt == 0]
    fitting = [bt for bt in feasible
               if _vmem_bytes_estimate(bt, seq, dim_in, dim_out, hdh, heads) <= vmem_budget]
    cands = fitting if fitting else [min(feasible)]
    deep = [bt for bt in cands if bs // bt >= target_steps]
    if deep:
        return max(deep)          # coarsest tile that still gives >= target steps
    return min(cands)             # otherwise as deep a grid as bs allows


def prepare_weights(wq, wk, wv, wo, compute_dtype=jnp.bfloat16):
    """Weight prep hoisted out of the per-call hot path (do this once).
    wq/wk/wv: [dim_in, heads*dh] in-major (torch W.T), heads concatenated along
    the out axis.  wo: [heads*dh, dim_out] in-major."""
    wqkv = jnp.concatenate([wq, wk, wv], axis=1).astype(compute_dtype)
    return wqkv, wo.astype(compute_dtype)


def self_attention(x, wqkv, wo, *, heads, batch_tile=None, internal_exp_dtype=None):
    """x: [bs, seq, dim_in] float32 (bf16 cast happens in-kernel).
    wqkv: [dim_in, 3*heads*dh] fused Q|K|V weights (from prepare_weights).
    wo:   [heads*dh, dim_out]."""
    bs, seq, dim_in = x.shape
    hdh, dim_out = wo.shape
    assert wqkv.shape == (dim_in, 3 * hdh) and hdh % heads == 0
    assert wqkv.dtype == wo.dtype

    if internal_exp_dtype is None:
        internal_exp_dtype = _default_internal_exp_dtype()
    if batch_tile is None:
        batch_tile = _pick_batch_tile(bs, seq, dim_in, dim_out, hdh, heads)
    assert bs % batch_tile == 0
    n_steps = bs // batch_tile

    vmem_est = _vmem_bytes_estimate(batch_tile, seq, dim_in, dim_out, hdh, heads)
    vmem_limit = int(min(100 * 1024 * 1024, max(32 * 1024 * 1024, int(1.5 * vmem_est))))

    dh = hdh // heads
    flops = (2 * bs * seq * dim_in * 3 * hdh          # QKV projection
             + 4 * heads * bs * seq * seq * dh        # scores + A^T V per head
             + 2 * bs * seq * seq * dh                # last-head att recompute
             + 2 * bs * seq * hdh * dim_out)          # output projection
    cost = pl.CostEstimate(
        flops=int(flops),
        transcendentals=int((heads + 1) * bs * seq * seq),
        bytes_accessed=int(4 * bs * seq * (dim_in + dim_out) + 4 * bs * seq * seq
                           + 2 * (dim_in * 3 * hdh + hdh * dim_out)))

    kernel = functools.partial(_self_attention_kernel, heads=heads,
                               internal_exp_dtype=internal_exp_dtype)

    y, att = pl.pallas_call(
        kernel,
        out_shape=(jax.ShapeDtypeStruct((bs, seq, dim_out), jnp.float32),
                   jax.ShapeDtypeStruct((bs, seq, seq), jnp.float32)),
        grid_spec=pltpu.PrefetchScalarGridSpec(
            num_scalar_prefetch=0,
            grid=(n_steps,),
            in_specs=[
                pl.BlockSpec((batch_tile, seq, dim_in), lambda b: (b, 0, 0)),
                pl.BlockSpec((dim_in, 3 * hdh), lambda b: (0, 0)),
                pl.BlockSpec((hdh, dim_out), lambda b: (0, 0)),
            ],
            out_specs=[
                pl.BlockSpec((batch_tile, seq, dim_out), lambda b: (b, 0, 0)),
                pl.BlockSpec((batch_tile, seq, seq), lambda b: (b, 0, 0)),
            ],
        ),
        compiler_params=pltpu.CompilerParams(
            dimension_semantics=("parallel",),
            vmem_limit_bytes=vmem_limit),
        cost_estimate=cost,
    )(x, wqkv, wo)
    return y, att


# --------------------------------------------------------------------------- #
# Pure-JAX reference (mirrors the kernel's MXU precision: bf16 operands,
# f32 accumulation, and the same internal exp dtype).
# --------------------------------------------------------------------------- #
def _reference(x, wq, wk, wv, wo, heads, compute_dtype=jnp.float32,
               internal_exp_dtype=jnp.float32):
    cd = compute_dtype
    dh = wq.shape[1] // heads
    xc = x.astype(cd)
    y_heads = []
    att = None
    for h in range(heads):
        sl = slice(h * dh, (h + 1) * dh)
        q = jnp.dot(xc, wq[:, sl].astype(cd), preferred_element_type=jnp.float32).astype(cd)
        k = jnp.dot(xc, wk[:, sl].astype(cd), preferred_element_type=jnp.float32).astype(cd)
        v = jnp.dot(xc, wv[:, sl].astype(cd), preferred_element_type=jnp.float32).astype(cd)
        e = jnp.einsum('bqd,bkd->bqk', q, k, preferred_element_type=jnp.float32)
        # internal softmax path (feeds y)
        m = jnp.max(e, axis=-1, keepdims=True)
        p = jnp.exp((e - m).astype(internal_exp_dtype)).astype(jnp.float32)
        a = p / jnp.sum(p, axis=-1, keepdims=True)
        y_h = jnp.einsum('bqk,bqd->bkd', a.astype(cd), v,
                         preferred_element_type=jnp.float32)        # A^T @ V
        y_heads.append(y_h.astype(cd))
        if h == heads - 1:
            att = jax.nn.softmax(e, axis=-1)                        # exact f32
    y = jnp.einsum('bsh,hd->bsd', jnp.concatenate(y_heads, axis=-1), wo.astype(cd),
                   preferred_element_type=jnp.float32)
    return y, att


# --------------------------------------------------------------------------- #
# Self-test
# --------------------------------------------------------------------------- #
if __name__ == "__main__":
    bs, seq = 2, 8
    input_size, output_size, heads = 32, 32, 2
    dh = output_size // heads

    key = jax.random.PRNGKey(0)
    kx, kq, kk, kv, ko = jax.random.split(key, 5)

    x = jax.random.normal(kx, (bs, seq, input_size), dtype=jnp.float32)

    # Deterministic "nn.Linear(bias=False)" weights stored in-major ([in, out],
    # i.e. torch W.T); per-head projection weights concatenated along the out axis.
    scale = 1.0 / jnp.sqrt(jnp.float32(input_size))
    wq = jax.random.normal(kq, (input_size, heads * dh), jnp.float32) * scale
    wk = jax.random.normal(kk, (input_size, heads * dh), jnp.float32) * scale
    wv = jax.random.normal(kv, (input_size, heads * dh), jnp.float32) * scale
    wo = jax.random.normal(ko, (output_size, input_size), jnp.float32) * scale

    internal_exp_dtype = _default_internal_exp_dtype()
    wqkv, wo_c = prepare_weights(wq, wk, wv, wo)           # once, off the hot path

    y, att = self_attention(x, wqkv, wo_c, heads=heads,
                            internal_exp_dtype=internal_exp_dtype)
    jax.block_until_ready((y, att))

    assert y.shape == (bs, seq, input_size)
    assert att.shape == (bs, seq, seq)

    # Returned attention uses the exact f32 softmax: rows sum to 1.
    assert jnp.allclose(jnp.sum(att, axis=-1), 1.0, atol=1e-5)

    y_ref, att_ref = _reference(x, wq, wk, wv, wo, heads,
                                compute_dtype=jnp.bfloat16,
                                internal_exp_dtype=internal_exp_dtype)
    assert jnp.allclose(att, att_ref, atol=5e-3, rtol=5e-3)
    assert jnp.allclose(y, y_ref, atol=2e-2, rtol=2e-2)

    print("KERNEL_OK")
</pallas_src>

<mosaic_0001>
module attributes {stable_mosaic.version = 11 : i64} {
  func.func @_self_attention_kernel(%arg0: i32, %arg1: memref<1x8x32xf32, #tpu.memory_space<vmem>>, %arg2: memref<32x96xbf16, #tpu.memory_space<vmem>>, %arg3: memref<32x32xbf16, #tpu.memory_space<vmem>>, %arg4: memref<1x8x32xf32, #tpu.memory_space<vmem>>, %arg5: memref<1x8x8xf32, #tpu.memory_space<vmem>>) attributes {dimension_semantics = [#tpu.dimension_semantics<parallel>], iteration_bounds = array<i64: 2>, scalar_prefetch = 0 : i64, scratch_operands = 0 : i64, tpu.core_type = #tpu.core_type<tc>, window_params = [{transform_indices = @transform_0, window_bounds = array<i64: 1, 8, 32>}, {pipeline_mode = #tpu.pipeline_mode<synchronous>, transform_indices = @transform_1, window_bounds = array<i64: 32, 96>}, {pipeline_mode = #tpu.pipeline_mode<synchronous>, transform_indices = @transform_2, window_bounds = array<i64: 32, 32>}, {transform_indices = @transform_3, window_bounds = array<i64: 1, 8, 32>}, {transform_indices = @transform_4, window_bounds = array<i64: 1, 8, 8>}]} {
    %c0 = arith.constant 0 : index
    %c0_0 = arith.constant 0 : index
    %c0_1 = arith.constant 0 : index
    %0 = vector.load %arg1[%c0, %c0_0, %c0_1] : memref<1x8x32xf32, #tpu.memory_space<vmem>>, vector<1x8x32xf32>
    %1 = arith.truncf %0 : vector<1x8x32xf32> to vector<1x8x32xbf16>
    %c0_2 = arith.constant 0 : index
    %c0_3 = arith.constant 0 : index
    %2 = vector.load %arg2[%c0_2, %c0_3] : memref<32x96xbf16, #tpu.memory_space<vmem>>, vector<32x96xbf16>
    %cst = arith.constant dense<0.000000e+00> : vector<1x8x96xf32>
    %3 = tpu.matmul %1, %2, %cst {dimension_numbers = #tpu.dot_dimension_numbers<[2], [0], [0, 1], [1], [0, 0, 0, 1, 1, 1], [], []>} : vector<1x8x32xbf16>, vector<32x96xbf16>, vector<1x8x96xf32> -> vector<1x8x96xf32>
    %4 = arith.truncf %3 : vector<1x8x96xf32> to vector<1x8x96xbf16>
    %5 = vector.extract_strided_slice %4 {offsets = [0, 0, 0], sizes = [1, 8, 16], strides = [1, 1, 1]} : vector<1x8x96xbf16> to vector<1x8x16xbf16>
    %6 = vector.extract_strided_slice %4 {offsets = [0, 0, 32], sizes = [1, 8, 16], strides = [1, 1, 1]} : vector<1x8x96xbf16> to vector<1x8x16xbf16>
    %7 = vector.extract_strided_slice %4 {offsets = [0, 0, 64], sizes = [1, 8, 16], strides = [1, 1, 1]} : vector<1x8x96xbf16> to vector<1x8x16xbf16>
    %cst_4 = arith.constant dense<0.000000e+00> : vector<1x8x8xf32>
    %8 = tpu.matmul %6, %5, %cst_4 {dimension_numbers = #tpu.dot_dimension_numbers<[2], [2], [1], [1], [0, 0, 0, 1, 1, 1], [0], [0]>} : vector<1x8x16xbf16>, vector<1x8x16xbf16>, vector<1x8x8xf32> -> vector<1x8x8xf32>
    %cst_5 = arith.constant dense<0xFF800000> : vector<1x8xf32>
    %9 = vector.multi_reduction <maximumf>, %8, %cst_5 [1] : vector<1x8x8xf32> to vector<1x8xf32>
    %10 = vector.shape_cast %9 : vector<1x8xf32> to vector<1x1x8xf32>
    %11 = vector.broadcast %10 : vector<1x1x8xf32> to vector<1x8x8xf32>
    %12 = arith.subf %8, %11 : vector<1x8x8xf32>
    %13 = math.exp %12 : vector<1x8x8xf32>
    %cst_6 = arith.constant dense<0.000000e+00> : vector<1x8xf32>
    %14 = vector.multi_reduction <add>, %13, %cst_6 [1] : vector<1x8x8xf32> to vector<1x8xf32>
    %15 = vector.shape_cast %14 : vector<1x8xf32> to vector<1x1x8xf32>
    %16 = tpu.reciprocal %15 {approx = true} : vector<1x1x8xf32> -> vector<1x1x8xf32>
    %17 = vector.broadcast %16 : vector<1x1x8xf32> to vector<1x8x8xf32>
    %18 = arith.mulf %13, %17 : vector<1x8x8xf32>
    %19 = arith.truncf %18 : vector<1x8x8xf32> to vector<1x8x8xbf16>
    %cst_7 = arith.constant dense<0.000000e+00> : vector<1x8x16xf32>
    %20 = tpu.matmul %19, %7, %cst_7 {dimension_numbers = #tpu.dot_dimension_numbers<[2], [1], [1], [2], [0, 0, 0, 1, 1, 2], [0], [0]>} : vector<1x8x8xbf16>, vector<1x8x16xbf16>, vector<1x8x16xf32> -> vector<1x8x16xf32>
    %21 = arith.truncf %20 : vector<1x8x16xf32> to vector<1x8x16xbf16>
    %22 = vector.extract_strided_slice %4 {offsets = [0, 0, 16], sizes = [1, 8, 16], strides = [1, 1, 1]} : vector<1x8x96xbf16> to vector<1x8x16xbf16>
    %23 = vector.extract_strided_slice %4 {offsets = [0, 0, 48], sizes = [1, 8, 16], strides = [1, 1, 1]} : vector<1x8x96xbf16> to vector<1x8x16xbf16>
    %24 = vector.extract_strided_slice %4 {offsets = [0, 0, 80], sizes = [1, 8, 16], strides = [1, 1, 1]} : vector<1x8x96xbf16> to vector<1x8x16xbf16>
    %cst_8 = arith.constant dense<0.000000e+00> : vector<1x8x8xf32>
    %25 = tpu.matmul %23, %22, %cst_8 {dimension_numbers = #tpu.dot_dimension_numbers<[2], [2], [1], [1], [0, 0, 0, 1, 1, 1], [0], [0]>} : vector<1x8x16xbf16>, vector<1x8x16xbf16>, vector<1x8x8xf32> -> vector<1x8x8xf32>
    %cst_9 = arith.constant dense<0xFF800000> : vector<1x8xf32>
    %26 = vector.multi_reduction <maximumf>, %25, %cst_9 [1] : vector<1x8x8xf32> to vector<1x8xf32>
    %27 = vector.shape_cast %26 : vector<1x8xf32> to vector<1x1x8xf32>
    %28 = vector.broadcast %27 : vector<1x1x8xf32> to vector<1x8x8xf32>
    %29 = arith.subf %25, %28 : vector<1x8x8xf32>
    %30 = math.exp %29 : vector<1x8x8xf32>
    %cst_10 = arith.constant dense<0.000000e+00> : vector<1x8xf32>
    %31 = vector.multi_reduction <add>, %30, %cst_10 [1] : vector<1x8x8xf32> to vector<1x8xf32>
    %32 = vector.shape_cast %31 : vector<1x8xf32> to vector<1x1x8xf32>
    %33 = tpu.reciprocal %32 {approx = true} : vector<1x1x8xf32> -> vector<1x1x8xf32>
    %34 = vector.broadcast %33 : vector<1x1x8xf32> to vector<1x8x8xf32>
    %35 = arith.mulf %30, %34 : vector<1x8x8xf32>
    %36 = arith.truncf %35 : vector<1x8x8xf32> to vector<1x8x8xbf16>
    %cst_11 = arith.constant dense<0.000000e+00> : vector<1x8x16xf32>
    %37 = tpu.matmul %36, %24, %cst_11 {dimension_numbers = #tpu.dot_dimension_numbers<[2], [1], [1], [2], [0, 0, 0, 1, 1, 2], [0], [0]>} : vector<1x8x8xbf16>, vector<1x8x16xbf16>, vector<1x8x16xf32> -> vector<1x8x16xf32>
    %38 = arith.truncf %37 : vector<1x8x16xf32> to vector<1x8x16xbf16>
    %cst_12 = arith.constant dense<0.000000e+00> : vector<1x8x8xf32>
    %39 = tpu.matmul %22, %23, %cst_12 {dimension_numbers = #tpu.dot_dimension_numbers<[2], [2], [1], [1], [0, 0, 0, 1, 1, 1], [0], [0]>} : vector<1x8x16xbf16>, vector<1x8x16xbf16>, vector<1x8x8xf32> -> vector<1x8x8xf32>
    %cst_13 = arith.constant dense<0xFF800000> : vector<1x8xf32>
    %40 = vector.multi_reduction <maximumf>, %39, %cst_13 [2] : vector<1x8x8xf32> to vector<1x8xf32>
    %41 = vector.shape_cast %40 : vector<1x8xf32> to vector<1x8x1xf32>
    %42 = vector.broadcast %41 : vector<1x8x1xf32> to vector<1x8x8xf32>
    %43 = arith.subf %39, %42 : vector<1x8x8xf32>
    %44 = math.exp %43 : vector<1x8x8xf32>
    %cst_14 = arith.constant dense<0.000000e+00> : vector<1x8xf32>
    %45 = vector.multi_reduction <add>, %44, %cst_14 [2] : vector<1x8x8xf32> to vector<1x8xf32>
    %46 = vector.shape_cast %45 : vector<1x8xf32> to vector<1x8x1xf32>
    %47 = vector.broadcast %46 : vector<1x8x1xf32> to vector<1x8x8xf32>
    %48 = arith.divf %44, %47 : vector<1x8x8xf32>
    %c0_15 = arith.constant 0 : index
    %c0_16 = arith.constant 0 : index
    %c0_17 = arith.constant 0 : index
    %49 = vector.load %arg5[%c0_15, %c0_16, %c0_17] : memref<1x8x8xf32, #tpu.memory_space<vmem>>, vector<1x8x8xf32>
    tpu.vector_store %arg5[%c0_15, %c0_16, %c0_17], %48 {strides = array<i32>} : memref<1x8x8xf32, #tpu.memory_space<vmem>>, vector<1x8x8xf32>,
    %50 = tpu.concatenate %21, %38 in 2 : vector<1x8x16xbf16>, vector<1x8x16xbf16> -> vector<1x8x32xbf16>
    %c0_18 = arith.constant 0 : index
    %c0_19 = arith.constant 0 : index
    %51 = vector.load %arg3[%c0_18, %c0_19] : memref<32x32xbf16, #tpu.memory_space<vmem>>, vector<32x32xbf16>
    %cst_20 = arith.constant dense<0.000000e+00> : vector<1x8x32xf32>
    %52 = tpu.matmul %50, %51, %cst_20 {dimension_numbers = #tpu.dot_dimension_numbers<[2], [0], [0, 1], [1], [0, 0, 0, 1, 1, 1], [], []>} : vector<1x8x32xbf16>, vector<32x32xbf16>, vector<1x8x32xf32> -> vector<1x8x32xf32>
    %c0_21 = arith.constant 0 : index
    %c0_22 = arith.constant 0 : index
    %c0_23 = arith.constant 0 : index
    %53 = vector.load %arg4[%c0_21, %c0_22, %c0_23] : memref<1x8x32xf32, #tpu.memory_space<vmem>>, vector<1x8x32xf32>
    tpu.vector_store %arg4[%c0_21, %c0_22, %c0_23], %52 {strides = array<i32>} : memref<1x8x32xf32, #tpu.memory_space<vmem>>, vector<1x8x32xf32>,
    return
  }
  func.func @transform_0(%arg0: i32) -> (i32, i32, i32) {
    %c0_i32 = arith.constant 0 : i32
    %c0_i32_0 = arith.constant 0 : i32
    %c0_i32_1 = arith.constant 0 : i32
    return %arg0, %c0_i32, %c0_i32_0 : i32, i32, i32
  }
  func.func @transform_1(%arg0: i32) -> (i32, i32) {
    %c0_i32 = arith.constant 0 : i32
    %c0_i32_0 = arith.constant 0 : i32
    %c0_i32_1 = arith.constant 0 : i32
    return %c0_i32, %c0_i32_0 : i32, i32
  }
  func.func @transform_2(%arg0: i32) -> (i32, i32) {
    %c0_i32 = arith.constant 0 : i32
    %c0_i32_0 = arith.constant 0 : i32
    %c0_i32_1 = arith.constant 0 : i32
    return %c0_i32, %c0_i32_0 : i32, i32
  }
  func.func @transform_3(%arg0: i32) -> (i32, i32, i32) {
    %c0_i32 = arith.constant 0 : i32
    %c0_i32_0 = arith.constant 0 : i32
    %c0_i32_1 = arith.constant 0 : i32
    return %arg0, %c0_i32, %c0_i32_0 : i32, i32, i32
  }
  func.func @transform_4(%arg0: i32) -> (i32, i32, i32) {
    %c0_i32 = arith.constant 0 : i32
    %c0_i32_0 = arith.constant 0 : i32
    %c0_i32_1 = arith.constant 0 : i32
    return %arg0, %c0_i32, %c0_i32_0 : i32, i32, i32
  }
}

</mosaic_0001>

<bundles_post_ra>
// kernel: tpu_custom_call.1
= control target key start
LH: loop header
LB: loop body
LE: loop exit
PB: predicated region body
PF: predicated region fallthrough
CT: control target
= control target key end

     0   :  { %10 = vsyncpa [#allocation3], 0  ;;  %s1215_s0 = inlined_call_operand.hbm [shape: f32[2,8,32], index: 0, kind: input, shape index: {}]   ;;  %s1216_s1 = inlined_call_operand.hbm [shape: bf16[32,96], index: 1, kind: input, shape index: {}]   ;;  %s1217_s2 = inlined_call_operand.hbm [shape: bf16[32,32], index: 2, kind: input, shape index: {}]   ;;  %s1218_s3 = inlined_call_operand.hbm [shape: f32[2,8,32], index: 3, kind: output, shape index: {0}]   ;;  %s1219_s4 = inlined_call_operand.hbm [shape: f32[2,8,8], index: 4, kind: output, shape index: {1}]  }
   0x1   :  { %12 = vsyncpa [#allocation3 + $0x1], 0 }
   0x2   :  { %13 = vsyncpa [#allocation6], 0 }
   0x3   :  { %14 = vsyncpa [#allocation4], 0 }
   0x4   :  { %16 = vsyncpa [#allocation4 + $0x1], 0 }
   0x5   :  { %17 = vsyncpa [#allocation10], 0 }
   0x6   :  { %19 = vsyncpa [#allocation10 + $0x1], 0  ;;  %s1032_s15 = smov 0   ;;  %s1034_s16 = smov 0  }
   0x7   :  { %s1036_s17 = smov 0   ;;  %s1038_s18 = smov 0  }
   0x8 LB: > { %s161_s21 = sshll.u32 %s1216_s1, 4  ;;  %s1056_s22 = sadd.s32 4294967295, %s995_s18   ;;  %s995_s18 = sphi %s1038_s18, %s1230_s18   ;;  %s991_s17 = sphi %s1036_s17, %s1229_s17   ;;  %s987_s16 = sphi %s1034_s16, %s1228_s16   ;;  %s983_s15 = sphi %s1032_s15, %s1227_s15   ;;  %s162_s21 = int_to_ptr.hbm [resolvable:$true] %s161_s21 }
   0x9   : > { %p666_p0 = scmp.ge.s32.totalorder %s995_s18, 1  ;;  %p46_p1 = scmp.eq.s32.totalorder %s1056_s22, 0 }
   0xa   : > { %p150_p2 = scmp.lt.s32.totalorder %s995_s18, 3  ;;  %s997_s24 = smov [#allocation5]  }
   0xb   : > { %s163_s25 = sshll.u32 %s997_s24, 4  ;;  %s175_s28 = sshll.u32 %s1217_s2, 4  ;;  %s164_s25 = int_to_ptr.vmem [resolvable:$true] %s163_s25  ;;  %s176_s28 = int_to_ptr.hbm [resolvable:$true] %s175_s28 }
   0xc   : > { %p1061_p3 = pnand %p666_p0, %p150_p2  ;;  %s998_s29 = smov [#allocation7]  }
   0xd   : > { %s177_s30 = sshll.u32 %s998_s29, 4  ;;  %s999_s5 = smov 64   ;;  %s178_s30 = int_to_ptr.vmem [resolvable:$true] %s177_s30 }
   0xe   : > { %p725_p4 = pneg %p1061_p3  ;;  %s1000_s6 = smov 4  }
   0xf   : > { %s665_s7 = sadd.s32 4294967294, %s995_s18   ;;  %s1075_s8 = sadd.s32 1, %s995_s18  }
  0x10   : > { %p726_p6 = pnand %p725_p4, %p46_p1  ;;  %s29_s9 = ssub.s32 %s995_s18, %s1075_s8 }
  0x11   : > { %s32_s10 = sadd.s32 1, %s991_s17  ;;  %p30_p7 = scmp.eq.s32.totalorder %s29_s9, 0 }
  0x12   : > { %728 = dma.hbm_to_vmem [thread:$0]  (!%p726_p6), %s162_s21, 256, %s164_s25, [#allocation6], %s999_s5, %s999_s5, %s1000_s6  }
  0x13   : > { %731 = dma.hbm_to_vmem [thread:$0]  (!%p726_p6), %s176_s28, 256, %s178_s30, [#allocation6], %s999_s5, %s999_s5, %s1000_s6  }
  0x14   : > { %p39_p8 = scmp.ne.s32.totalorder %s991_s17, %s987_s16  ;;  %p40_p9 = scmp.eq.s32.totalorder %s995_s18, 0 }
  0x15   : > { %p45_p10 = scmp.ne.s32.totalorder %s987_s16, %s983_s15  ;;  %p111_p13 = scmp.eq.s32.totalorder %s1056_s22, 1 }
  0x16   : > { %s1086_s11 = scalar_select %p30_p7, %s991_s17, %s32_s10  }
  0x17   : > { %p1088_p11 = por %p40_p9, %p39_p8  ;;  %p1094_p12 = por %p46_p1, %p45_p10 }
  0x18   : > { %p117_p0 = scmp.eq.s32.totalorder %s665_s7, 1  ;;  %p745_p2 = scmp.lt.s32.totalorder %s995_s18, 2 }
  0x19   : > { %s191_s14 = sand.u32 1, %s991_s17   ;;  %p1101_p4 = por %p111_p13, %p39_p8 }
  0x1a   : > { %p1105_p6 = por %p117_p0, %p45_p10  ;;  %s670_s21 = sshll.u32 %s191_s14, 3 }
  0x1b   : > { %s671_s24 = sshll.u32 %s995_s18, 3  ;;  %s195_s28 = scalar_lea.vmem [#allocation2], %s670_s21 }
  0x1c   : > { %s199_s27 = scalar_lea.hbm %s1215_s0, %s671_s24  ;;  %s203_s29 = sshll.u32 %s195_s28, 4  ;;  %s204_s29 = int_to_ptr.vmem [resolvable:$true] %s203_s29 }
  0x1d   : > { %s201_s30 = sshll.u32 %s199_s27, 4  ;;  %p1115_p7 = pnand %p745_p2, %p1088_p11  ;;  %s202_s30 = int_to_ptr.hbm [resolvable:$true] %s201_s30 }
  0x1e   : > { %s192_s6 = scalar_lea.sflag [#allocation3], %s191_s14  ;;  %s863_s7 = sshra.s32 %s202_s30, 4  ;;  %s864_s7 = int_to_ptr.hbm [resolvable:$true] %s863_s7 }
  0x1f   : > { %s865_s9 = scalar_lea.hbm %s864_s7, 8  ;;  %p867_p9 = pneg %p1115_p7 }
  0x20   : > { %p866_p8 = scmp.ne.s32.totalorder %s864_s7, %s865_s9  ;;  %s870_s24 = scalar_lea.hbm %s1215_s0, 16 }
  0x21   : > { %p871_p11 = scmp.lt.s32.totalorder %s864_s7, %s1215_s0  ;;  %p872_p0 = scmp.lt.s32.totalorder %s870_s24, %s865_s9 }
  0x22   : > { %p868_p10 = pnand %p867_p9, %p866_p8 }
  0x23   : > { %p873_p2 = por %p872_p0, %p871_p11 }
  0x24   : > { %p869_p13 = pneg %p868_p10 }
  0x26   : > { %p874_p5 = pnand %p873_p2, %p869_p13 }
  0x28   : > { %877 = shalt.err (!%p874_p5)
}
  0x29   : > { %735 = dma.hbm_to_vmem [thread:$0]  (!%p1115_p7), %s202_s30, 128, %s204_s29, %s192_s6  }
  0x2a   : > { %212 = sbr.rel (%p1061_p3) target bundleno = 866 (0x362), region = 32  ;;  %s1132_s14 = sand.u32 (!%p1061_p3), 1, %s987_s16  }
  0x2b   : > { %s1135_s26 = sshll.u32 (!%p1061_p3), %s1132_s14, 3  ;;  %s215_s27 = scalar_lea.sflag (!%p1061_p3), [#allocation3], %s1132_s14 }
  0x2c   : > { %s218_s28 = scalar_lea.vmem (!%p1061_p3), [#allocation2], %s1135_s26 }
  0x2f   : > { %966 = dma.done.wait (%p1094_p12), %s215_s27, 128  }
  0x30   : > { %968 = vsyncadd (%p1094_p12), %s215_s27, 4294967168 }
  0x31   : > { %970 = dma.done.wait (%p46_p1), [#allocation6], 512  }
  0x32   : > { %972 = vsyncadd (%p46_p1), [#allocation6], 4294966784  ;;  %v708_v0 = vld [vmem:[#allocation5 + $0x8] sm:$0xff]  ;;  %v707_v1 = vld [vmem:[#allocation5] sm:$0xff]  ;;  %vm278_vm0 = vcmask 261120   ;;  %vm301_vm1 = vcmask 130048  }
  0x33   : > { %288 = vmatpush.bf16.msra.mxu0 %v708_v0  ;;  %v260_v2 = vld [vmem:[%s218_s28] sm:$0xff]  ;;  %s1001_s23 = smov 48   ;;  %s1002_s13 = smov 80   ;;  %vm347_vm2 = vcmask 1043456   ;;  %vm321_vm3 = vcmask 64512  }
  0x34   : > { %v261_v3 = vpack.c.bf16 %v260_v2, %v260_v2  ;;  %s1003_s29 = smov 96   ;;  %s1004_s30 = smov 64  }
  0x35   : > { %s1005_s5 = smov 112   ;;  %s1006_s6 = smov 16  }
  0x36   : > { %s258_s7 = scalar_lea.vmem [#allocation9], %s1135_s26  ;;  %s703_s9 = sshll.u32 %s1056_s22, 3 }
  0x37   : > { %289 = vmatpush.bf16.msra.mxu0 %v707_v1  ;;  %s538_s24 = scalar_lea.hbm %s1219_s4, %s703_s9  ;;  %s540_s25 = sshll.u32 %s258_s7, 4  ;;  %s541_s25 = int_to_ptr.vmem [resolvable:$true] %s540_s25 }
  0x38   : > { %s542_s12 = sshll.u32 %s538_s24, 4  ;;  %s514_s27 = scalar_lea.sflag [#allocation10], %s1132_s14  ;;  %s543_s12 = int_to_ptr.hbm [resolvable:$true] %s542_s12 }
  0x39   : > { %s907_s28 = sshra.s32 %s543_s12, 4  ;;  %s913_s22 = scalar_lea.hbm %s1219_s4, 16  ;;  %s908_s28 = int_to_ptr.hbm [resolvable:$true] %s907_s28 }
  0x3a   : > { %686 = vmatmul.msk.bf16.vlgmr.msra.gmra.mxu0 %vm278_vm0, %v261_v3  ;;  %p914_p12 = scmp.lt.s32.totalorder %s908_s28, %s1219_s4 }
  0xb7   : > { %v291_v4 = vpop.f32.mrf.mxu0 }
  0xb8   : > { %v295_v5 = vpack.c.bf16 %v291_v4, %v291_v4 }
  0xba   : > { %v297_v6 = vunpack.c.l.b16 %v295_v5  ;;  %v306_v7 = vsel %vm301_vm1, %v295_v5, 0 }
  0xbb   : > { %315 = vmatpush.bf16.xpose.msra.mxu1 %v306_v7 }
  0xbc   : > { %v298_v8 = vpack.c.b16 %v297_v6, %v297_v6 }
  0xbe   : > { %408 = vrot.lane.b32.xlu2 %v298_v8, %s1001_s23  ;;  %365 = vrot.lane.b32.xlu1 %v298_v8, %s1002_s13  ;;  %s909_s23 = scalar_lea.hbm %s908_s28, 8 }
  0xbf   : > { %299 = vrot.lane.b32.xlu0 %v298_v8, %s1003_s29  ;;  %v293_v9 = vpop.f32.mrf.mxu0  ;;  %p910_p1 = scmp.ne.s32.totalorder %s908_s28, %s909_s23  ;;  %p915_p7 = scmp.lt.s32.totalorder %s913_s22, %s909_s23 }
  0xc1   : > { %p911_p3 = pnand %p910_p1, %p1101_p4  ;;  %p916_p8 = por %p915_p7, %p914_p12 }
  0xc3   : > { %p912_p5 = pneg %p911_p3 }
  0xc5   : > { %p917_p9 = pnand %p916_p8, %p912_p5 }
  0xc6   : > { %342 = vrot.lane.b32.xlu1 %v298_v8, %s1004_s30 }
  0xc7   : > { %367 = vrot.lane.b32.xlu0 %v298_v8, %s1005_s5 }
 0x118   : > { %v409_v13 = vpop.permute.xlu2 %408 }
 0x119   : > { %v414_v18 = vsel %vm347_vm2, %v409_v13, 0 }
 0x130   : > { %v366_v10 = vpop.permute.xlu1 %365 }
 0x131   : > { %v300_v11 = vpop.permute.xlu0 %299  ;;  %v370_v12 = vsel %vm301_vm1, %v366_v10, 0 }
 0x132   : > { %687 = vmatmul.msk.bf16.vlgmr.msra.gmra.mxu1 %vm301_vm1, %v300_v11  ;;  %437 = vmatpush.bf16.xpose.msrb.mxu0 %v370_v12 }
 0x138   : > { %v343_v14 = vpop.permute.xlu1 %342 }
 0x139   : > { %v368_v15 = vpop.permute.xlu0 %367  ;;  %v349_v16 = vsel %vm347_vm2, %v343_v14, 0  ;;  %v710_v14 = vld [vmem:[#allocation7 + $0x8] sm:$0xff] }
 0x13a   : > { %691 = vmatmul.msk.bf16.vlgmr.msrb.gmra.mxu0 %vm301_vm1, %v368_v15  ;;  %358 = vmatpush.bf16.msra.mxu2 %v349_v16  ;;  %v373_v17 = vsel %vm301_vm1, %v368_v15, 0  ;;  %v709_v15 = vld [vmem:[#allocation7] sm:$0xff] }
 0x13b   : > { %382 = vmatpush.bf16.xpose.msra.mxu3 %v373_v17  ;;  %500 = vmatpush.bf16.msrb.mxu1 %v710_v14 }
 0x13e   : > { %423 = vmatpush.bf16.msrb.mxu2 %v414_v18 }
 0x13f   : > { %501 = vmatpush.bf16.msrb.mxu1 %v709_v15 }
 0x142   : > { %689 = vmatmul.msk.bf16.vlgmr.msra.gmra.mxu3 %vm301_vm1, %v366_v10 }
 0x1af   : > { %v317_v19 = vpop.f32.mrf.mxu1 }
 0x1b0   : > { %v322_v20 = vsel %vm321_vm3, %v317_v19, -inf }
 0x1b1   : > { %v323_v21 = vrot.slane %v322_v20, 4 }
 0x1b3   : > { %v324_v22 = vmax.f32 %v322_v20, %v323_v21 }
 0x1b5   : > { %v325_v23 = vrot.slane %v324_v22, 2 }
 0x1b7   : > { %v326_v24 = vmax.f32 %v324_v22, %v325_v23  ;;  %v319_v25 = vpop.f32.mrf.mxu1  ;;  %v439_v26 = vpop.f32.mrf.mxu0 }
 0x1b8   : > { %v443_v27 = vsel %vm321_vm3, %v439_v26, -inf }
 0x1b9   : > { %v327_v28 = vrot.slane %v326_v24, 1  ;;  %444 = vmax.xlane.f32.xlu0 %v443_v27 }
 0x1bb   : > { %v328_v29 = vmax.f32 %v326_v24, %v327_v28 }
 0x1bd   : > { %v329_v30 = vsub.f32 %v317_v19, %v328_v29 }
 0x1bf   : > { %v330_v31 = vmul.f32 1.442695, %v329_v30  ;;  %v441_v32 = vpop.f32.mrf.mxu0 }
 0x1c1   : > { %791 = vpow2.f32 %v330_v31 }
 0x1c5   : > { %v384_v33 = vpop.f32.mrf.mxu3 }
 0x1c6   : > { %v388_v34 = vsel %vm321_vm3, %v384_v33, -inf }
 0x1c7   : > { %v792_v35 = vpop.eup %791  ;;  %v389_v36 = vrot.slane %v388_v34, 4 }
 0x1c8   : > { %v332_v37 = vsel %vm321_vm3, %v792_v35, 0.0 }
 0x1c9   : > { %v333_v38 = vrot.slane %v332_v37, 4  ;;  %v390_v39 = vmax.f32 %v388_v34, %v389_v36 }
 0x1cb   : > { %v334_v40 = vadd.f32 %v333_v38, %v332_v37  ;;  %v391_v41 = vrot.slane %v390_v39, 2 }
 0x1cd   : > { %v335_v42 = vrot.slane %v334_v40, 2  ;;  %v392_v43 = vmax.f32 %v390_v39, %v391_v41  ;;  %v386_v44 = vpop.f32.mrf.mxu3 }
 0x1cf   : > { %v336_v45 = vadd.f32 %v335_v42, %v334_v40  ;;  %v393_v46 = vrot.slane %v392_v43, 1 }
 0x1d1   : > { %v394_v47 = vmax.f32 %v392_v43, %v393_v46  ;;  %v337_v48 = vrot.slane %v336_v45, 1 }
 0x1d3   : > { %v395_v49 = vsub.f32 %v384_v33, %v394_v47  ;;  %v338_v50 = vadd.f32 %v337_v48, %v336_v45 }
 0x1d5   : > { %v396_v51 = vmul.f32 1.442695, %v395_v49  ;;  %793 = vrcp.f32 %v338_v50 }
 0x1d7   : > { %795 = vpow2.f32 %v396_v51 }
 0x1db   : > { %v794_v52 = vpop.eup %793 }
 0x1dc   : > { %v340_v53 = vmul.f32 %v794_v52, %v792_v35 }
 0x1dd   : > { %v796_v54 = vpop.eup %795 }
 0x1de   : > { %v398_v55 = vsel %vm321_vm3, %v796_v54, 0.0  ;;  %v341_v56 = vpack.c.bf16 %v340_v53, %v340_v53 }
 0x1df   : > { %v399_v57 = vrot.slane %v398_v55, 4 }
 0x1e0   : > { %688 = vmatmul.msk.bf16.vlgmr.msra.gmra.mxu2 %vm321_vm3, %v341_v56 }
 0x1e1   : > { %v400_v58 = vadd.f32 %v399_v57, %v398_v55 }
 0x1e3   : > { %v401_v59 = vrot.slane %v400_v58, 2 }
 0x1e5   : > { %v402_v60 = vadd.f32 %v401_v59, %v400_v58 }
 0x1e7   : > { %v403_v61 = vrot.slane %v402_v60, 1 }
 0x1e9   : > { %v404_v62 = vadd.f32 %v403_v61, %v402_v60 }
 0x1eb   : > { %797 = vrcp.f32 %v404_v62 }
 0x1f1   : > { %v798_v63 = vpop.eup %797 }
 0x1f2   : > { %v406_v0 = vmul.f32 %v798_v63, %v796_v54 }
 0x1f4   : > { %v407_v1 = vpack.c.bf16 %v406_v0, %v406_v0 }
 0x1f6   : > { %690 = vmatmul.msk.bf16.vlgmr.msrb.gmra.mxu2 %vm321_vm3, %v407_v1 }
 0x22c   : > { %v445_v2 = vpop.xlane.xlu0 %444 }
 0x22d   : > { %v446_v3 = vsub.f32 %v439_v26, %v445_v2 }
 0x22f   : > { %v447_v4 = vmul.f32 1.442695, %v446_v3 }
 0x231   : > { %799 = vpow2.f32 %v447_v4 }
 0x237   : > { %v800_v5 = vpop.eup %799 }
 0x238   : > { %v449_v6 = vsel %vm321_vm3, %v800_v5, 0.0 }
 0x239   : > { %450 = vadd.xlane.f32.xlu1 %v449_v6 }
 0x263   : > { %v360_v7 = vpop.f32.mrf.mxu2 }
 0x264   : > { %v364_v28 = vpack.c.bf16 %v360_v7, %v360_v7 }
 0x26b   : > { %v362_v8 = vpop.f32.mrf.mxu2 }
 0x279   : > { %v425_v9 = vpop.f32.mrf.mxu2 }
 0x27a   : > { %v429_v10 = vpack.c.bf16 %v425_v9, %v425_v9 }
 0x27c   : > { %v469_v11 = vunpack.c.l.b16 %v429_v10 }
 0x27e   : > { %v470_v12 = vpack.c.b16 %v469_v11, %v469_v11 }
 0x280   : > { %471 = vrot.lane.b32.xlu2 %v470_v12, %s1006_s6 }
 0x281   : > { %v427_v13 = vpop.f32.mrf.mxu2 }
 0x2ac   : > { %v451_v16 = vpop.xlane.xlu1 %450 }
 0x2ad   : > { %801 = vrcp.f32 %v451_v16  ;;  %v463_v20 = vand.u32 2147483648, %v451_v16  ;;  %v461_v22 = vand.u32 2147483647, %v451_v16  ;;  %vm457_vm5 = vweird.f32 %v451_v16 }
 0x2af   : > { %v464_v24 = vor.u32 1.1754944e-38, %v463_v20  ;;  %vm462_vm7 = vcmp.eq.f32.partialorder %v461_v22, 8.507059e+37 }
 0x2b3   : > { %v802_v17 = vpop.eup %801 }
 0x2b4   : > { %v453_v18 = vmul.f32 %v802_v17, %v451_v16  ;;  %vm458_vm4 = vweird.f32 %v802_v17 }
 0x2b5   : > { %vm459_vm6 = vmor %vm457_vm5, %vm458_vm4 }
 0x2b6   : > { %v454_v19 = vsub.f32 1.0, %v453_v18 }
 0x2b8   : > { %v455_v21 = vmul.f32 %v802_v17, %v454_v19 }
 0x2ba   : > { %v456_v23 = vadd.f32 %v802_v17, %v455_v21 }
 0x2bc   : > { %v460_v25 = vsel %vm459_vm6, %v802_v17, %v456_v23 }
 0x2bd   : > { %v465_v26 = vsel %vm462_vm7, %v464_v24, %v460_v25 }
 0x2be   : > { %v466_v27 = vmul.f32 %v800_v5, %v465_v26 }
 0x2c0   : > { %467 = vst.msk [vmem:[%s258_s7] sm:$0xff] %vm321_vm3, %v466_v27 }
 0x2da   : > { %v472_v29 = vpop.permute.xlu2 %471 }
 0x2db   : > { %v475_v30 = vsel %vm301_vm1, %v364_v28, %v472_v29 }
 0x2dc   : > { %700 = vmatmul.msk.bf16.vlgmr.msrb.gmra.mxu1 %vm278_vm0, %v475_v30 }
 0x2dd   : > { %920 = shalt.err (!%p917_p9)
}
 0x2de   : > { %722 = dma.vmem_to_hbm [thread:$0]  (%p1101_p4), %s541_s25, 128, %s543_s12, %s514_s27  }
 0x2df   : > { %s524_s10 = scalar_lea.hbm %s1218_s3, %s703_s9  ;;  %s251_s21 = scalar_lea.vmem [#allocation8], %s1135_s26 }
 0x2e0   : > { %s526_s24 = sshll.u32 %s251_s21, 4  ;;  %s528_s13 = sshll.u32 %s524_s10, 4  ;;  %s527_s24 = int_to_ptr.vmem [resolvable:$true] %s526_s24  ;;  %s529_s13 = int_to_ptr.hbm [resolvable:$true] %s528_s13 }
 0x2e1   : > { %s509_s28 = scalar_lea.sflag [#allocation4], %s1132_s14  ;;  %s935_s23 = sshra.s32 %s529_s13, 4  ;;  %s936_s23 = int_to_ptr.hbm [resolvable:$true] %s935_s23 }
 0x2e2   : > { %s937_s29 = scalar_lea.hbm %s936_s23, 8  ;;  %s941_s9 = scalar_lea.hbm %s1218_s3, 16 }
 0x2e3   : > { %p938_p10 = scmp.ne.s32.totalorder %s936_s23, %s937_s29  ;;  %p942_p0 = scmp.lt.s32.totalorder %s936_s23, %s1218_s3 }
 0x2e4   : > { %p943_p2 = scmp.lt.s32.totalorder %s941_s9, %s937_s29 }
 0x2e5   : > { %p939_p13 = pnand %p938_p10, %p1101_p4 }
 0x2e6   : > { %p944_p1 = por %p943_p2, %p942_p0 }
 0x2e7   : > { %p940_p11 = pneg %p939_p13 }
 0x2e9   : > { %p945_p3 = pnand %p944_p1, %p940_p11 }
 0x359   : > { %v503_v31 = vpop.f32.mrf.mxu1 }
 0x35a   : > { %507 = vst.msk [vmem:[%s251_s21] sm:$0xff] %vm278_vm0, %v503_v31 }
 0x35b   : > { %948 = shalt.err (!%p945_p3)
}
 0x35c   : > { %721 = dma.vmem_to_hbm [thread:$0]  (%p1101_p4), %s527_s24, 128, %s529_s13, %s509_s28  }
 0x361   : > { %v505_v32 = vpop.f32.mrf.mxu1 }
 0x362 PF: > { %s554_s14 = sand.u32 1, %s983_s15   ;;  %p1226_p5 = scmp.ge.s32.totalorder %s995_s18, 2 }
 0x363   : > { %s555_s22 = scalar_lea.sflag [#allocation4], %s554_s14 }
 0x364   : > { %p737_p12 = pnand %p1226_p5, %p1105_p6 }
 0x366   : > { %p738_p7 = pneg %p737_p12 }
 0x368   : > { %974 = dma.done.wait (%p738_p7), %s555_s22, 128  }
 0x369   : > { %976 = vsyncadd (%p738_p7), %s555_s22, 4294967168  ;;  %s565_s30 = scalar_lea.sflag [#allocation10], %s554_s14 }
 0x36a   : > { %978 = dma.done.wait (%p738_p7), %s565_s30, 128  }
 0x36b   : > { %980 = vsyncadd (%p738_p7), %s565_s30, 4294967168  ;;  %p22_p4 = scmp.ge.s32.totalorder %s1075_s8, 4   ;;  %s1227_s15 = smov %s987_s16 }
 0x36c   : > { %s1228_s16 = smov %s991_s17  ;;  %s1229_s17 = smov %s1086_s11 }
 0x36d   : > { %s1230_s18 = smov %s1075_s8  ;;  %24 = sbr.rel (!%p22_p4) target bundleno = 8 (0x8), region = 102 }
 0x372   :  { %571 = vsyncpa [#allocation3], 1 }
 0x373   :  { %573 = vsyncpa [#allocation3 + $0x1], 1 }
 0x374   :  { %574 = vsyncpa [#allocation6], 1 }
 0x375   :  { %575 = vsyncpa [#allocation4], 1 }
 0x376   :  { %577 = vsyncpa [#allocation4 + $0x1], 1 }
 0x377   :  { %578 = vsyncpa [#allocation10], 1 }
 0x378   :  { %580 = vsyncpa [#allocation10 + $0x1], 1 }

</bundles_post_ra>
